<compile_context>
chip_gen: v5e
topology: v5e:2x2
jax: 0.10.0
libtpu: 0.0.40
codegen_flags: <defaults>
</compile_context>

<pallas_src>
import math
import functools

import jax
import jax.numpy as jnp
from jax.experimental import pallas as pl
from jax.experimental.pallas import tpu as pltpu


# ------------------------------ small helpers --------------------------------

def _layer_norm_f32(x, gamma, beta, eps=1e-5):
    mean = jnp.mean(x, axis=-1, keepdims=True)
    var = jnp.mean((x - mean) ** 2, axis=-1, keepdims=True)
    return (x - mean) * jax.lax.rsqrt(var + eps) * gamma + beta


def _gelu_tanh(x):
    # GELU(approximate='tanh'), exactly as PyTorch defines it (f32 math).
    c = math.sqrt(2.0 / math.pi)
    return 0.5 * x * (1.0 + jnp.tanh(c * (x + 0.044715 * x * x * x)))


def _pick_tile(T, target):
    """Largest divisor of T that is <= target and a multiple of 8 (or T itself)."""
    if T <= target:
        return T
    for t in range(min(target, T), 7, -1):
        if T % t == 0 and t % 8 == 0:
            return t
    return T


def _device_kind():
    try:
        return jax.devices()[0].device_kind.lower()
    except Exception:
        return ""


# ------------------- kernel 1: ln_1 + fused QKV projection -------------------

def _ln_qkv_kernel(x_ref, g_ref, b_ref, w_ref, bias_ref,
                   q_ref, k_ref, v_ref, *, n_head, head_size, scale):
    C = n_head * head_size
    x = x_ref[0].astype(jnp.float32)                       # (tr, C)
    h = _layer_norm_f32(x, g_ref[...], b_ref[...])         # f32 statistics
    qkv = jnp.dot(h.astype(jnp.bfloat16), w_ref[...],      # bf16 MXU, f32 acc
                  preferred_element_type=jnp.float32) + bias_ref[...]
    # Head split done here (VMEM layout plumbing, once per row tile) so the
    # wrapper needs no split/transpose HBM passes.  1/sqrt(hs) folded into Q.
    for hd in range(n_head):
        lo = hd * head_size
        q_ref[0, hd] = (qkv[:, lo:lo + head_size] * scale).astype(q_ref.dtype)
        k_ref[0, hd] = qkv[:, C + lo:C + lo + head_size].astype(k_ref.dtype)
        v_ref[0, hd] = qkv[:, 2 * C + lo:2 * C + lo + head_size].astype(v_ref.dtype)


# --------------------- kernel 2: causal flash attention ----------------------

def _flash_attn_kernel(q_ref, k_ref, v_ref, o_ref, m_sc, l_sc, acc_sc, *,
                       exp_dtype):
    qi = pl.program_id(1)
    ki = pl.program_id(2)
    _, n_head, tq, hs = q_ref.shape
    tk = k_ref.shape[2]

    @pl.when(ki == 0)
    def _init():
        m_sc[...] = jnp.full(m_sc.shape, -jnp.inf, dtype=m_sc.dtype)
        l_sc[...] = jnp.zeros(l_sc.shape, dtype=l_sc.dtype)
        acc_sc[...] = jnp.zeros(acc_sc.shape, dtype=acc_sc.dtype)

    first_q = qi * tq
    last_q = first_q + (tq - 1)
    first_k = ki * tk
    last_k = first_k + (tk - 1)

    def scores():
        # Q already carries the 1/sqrt(hs) scale (folded in kernel 1).
        return jnp.einsum("hqd,hkd->hqk", q_ref[0], k_ref[0],
                          preferred_element_type=jnp.float32)      # (H,tq,tk) f32

    def accumulate(s):
        m_prev = m_sc[...]
        m_new = jnp.maximum(m_prev, jnp.max(s, axis=-1, keepdims=True))
        alpha = jnp.exp(m_prev - m_new)                            # f32
        p = jnp.exp((s - m_new).astype(exp_dtype))                 # bf16 EUP on v6e/v7x
        l_sc[...] = alpha * l_sc[...] + jnp.sum(
            p.astype(jnp.float32), axis=-1, keepdims=True)         # l stays f32
        pv = jnp.einsum("hqk,hkd->hqd", p.astype(v_ref.dtype), v_ref[0],
                        preferred_element_type=jnp.float32)
        acc_sc[...] = alpha * acc_sc[...] + pv
        m_sc[...] = m_new

    # Interior tile: strictly below the causal diagonal -> no mask needed.
    @pl.when(last_k <= first_q)
    def _interior():
        accumulate(scores())

    # Diagonal tile: build the per-tile causal mask from iotas.
    @pl.when(jnp.logical_and(first_k <= last_q, last_k > first_q))
    def _diagonal():
        s = scores()
        qpos = first_q + jax.lax.broadcasted_iota(jnp.int32, (tq, tk), 0)
        kpos = first_k + jax.lax.broadcasted_iota(jnp.int32, (tq, tk), 1)
        accumulate(jnp.where((qpos >= kpos)[None, :, :], s, -jnp.inf))

    # Fully-masked tiles (first_k > last_q): no compute, and their K/V
    # index_map is clamped in the wrapper so they issue no DMA either.

    @pl.when(ki == pl.num_programs(2) - 1)
    def _finalize():
        inv_l = pl.reciprocal(l_sc[...], approx=True)              # EUP slot
        o = acc_sc[...] * inv_l                                    # (H, tq, hs) f32
        # Merge heads -> lane-dense (tq, C) output block (full-width DMA store).
        for hd in range(n_head):
            o_ref[0, :, hd * hs:(hd + 1) * hs] = o[hd].astype(o_ref.dtype)


# -------- kernel 3: out-proj + residual + ln_2 + MLP + residual --------------

def _proj_mlp_kernel(x_ref, y_ref, wpr_ref, bpr_ref, g2_ref, b2_ref,
                     wfc_ref, bfc_ref, wp2_ref, bp2_ref, o_ref):
    x = x_ref[0].astype(jnp.float32)                       # (tr, C) residual
    y = y_ref[0]                                           # (tr, C) bf16 attn out
    attn = jnp.dot(y, wpr_ref[...],
                   preferred_element_type=jnp.float32) + bpr_ref[...]
    x1 = x + attn

    h2 = _layer_norm_f32(x1, g2_ref[...], b2_ref[...])
    f = jnp.dot(h2.astype(jnp.bfloat16), wfc_ref[...],
                preferred_element_type=jnp.float32) + bfc_ref[...]
    f = _gelu_tanh(f)                                      # f32 elementwise
    m2 = jnp.dot(f.astype(jnp.bfloat16), wp2_ref[...],
                 preferred_element_type=jnp.float32) + bp2_ref[...]
    o_ref[0] = (x1 + m2).astype(o_ref.dtype)


# -------------------------------- wrapper -------------------------------------

def gpt2_block(x, params, n_head, *, row_tile=None, q_tile=None, kv_tile=None):
    """x: (B, T, C); params: dict of weights; returns (B, T, C)."""
    B, T, C = x.shape
    assert C % n_head == 0
    hs = C // n_head

    kind = _device_kind()
    is_v5 = "v5" in kind
    is_v6 = ("v6" in kind) or ("tpu6" in kind)
    is_v7 = ("v7" in kind) or ("tpu7" in kind)
    big_vmem = is_v5 or is_v6                 # 128 MiB VMEM parts

    if row_tile is None:                      # kernels 1 & 3: weight-resident
        row_tile = 512 if big_vmem else 256
    if q_tile is None:                        # 256 fills the 256-wide MXU on v6e/v7x
        q_tile = 128 if is_v5 else 256        # v5e MXU is 128x128 -> keep 128
    if kv_tile is None:
        kv_tile = 128 if is_v5 else 256

    tr = _pick_tile(T, row_tile)
    tq = _pick_tile(T, q_tile)
    tk = _pick_tile(T, kv_tile)

    vmem_limit = (100 if big_vmem else 48) * 1024 * 1024
    # bf16 exp ~doubles EUP throughput on v6e/v7x; v5e has no bf16 VPU/EUP.
    exp_dtype = jnp.bfloat16 if (is_v6 or is_v7) else jnp.float32

    f32, bf16 = jnp.float32, jnp.bfloat16
    # Weights in bf16 (MXU-native); biases / LN params stay f32.
    wqkv = params["wqkv"].astype(bf16)
    wpr = params["wpr"].astype(bf16)
    wfc = params["wfc"].astype(bf16)
    wp2 = params["wp2"].astype(bf16)
    g1, b1 = params["g1"].astype(f32), params["b1"].astype(f32)
    g2, b2 = params["g2"].astype(f32), params["b2"].astype(f32)
    bqkv, bpr = params["bqkv"].astype(f32), params["bpr"].astype(f32)
    bfc, bp2 = params["bfc"].astype(f32), params["bp2"].astype(f32)

    def rep2(shape):
        # Whole-array (grid-invariant) block broadcast to every (b, i) step.
        nd = len(shape)
        return pl.BlockSpec(shape, lambda b, i, _nd=nd: (0,) * _nd)

    cp2 = pltpu.CompilerParams(
        dimension_semantics=("parallel", "parallel"),
        vmem_limit_bytes=vmem_limit)

    # ---- 1) ln_1 + QKV, emitting Q/K/V already in (B, H, T, hs) layout ------
    head_spec = pl.BlockSpec((1, n_head, tr, hs), lambda b, i: (b, 0, i, 0))
    qh, kh, vh = pl.pallas_call(
        functools.partial(_ln_qkv_kernel, n_head=n_head, head_size=hs,
                          scale=1.0 / math.sqrt(hs)),
        out_shape=(jax.ShapeDtypeStruct((B, n_head, T, hs), bf16),) * 3,
        grid_spec=pltpu.PrefetchScalarGridSpec(
            num_scalar_prefetch=0,
            grid=(B, T // tr),
            in_specs=[pl.BlockSpec((1, tr, C), lambda b, i: (b, i, 0)),
                      rep2(g1.shape), rep2(b1.shape),
                      rep2(wqkv.shape), rep2(bqkv.shape)],
            out_specs=[head_spec, head_spec, head_spec]),
        compiler_params=cp2,
    )(x, g1, b1, wqkv, bqkv)

    # ---- 2) flash attention; output written head-merged & lane-dense --------
    def kv_index_map(b, qi, ki):
        # Clamp past-diagonal KV tiles to the last causally valid one so Pallas
        # re-uses the resident block and skips ~50% of the K/V DMA traffic.
        last_valid = (qi * tq + (tq - 1)) // tk
        return (b, 0, jnp.minimum(ki, last_valid), 0)

    y = pl.pallas_call(
        functools.partial(_flash_attn_kernel, exp_dtype=exp_dtype),
        out_shape=jax.ShapeDtypeStruct((B, T, C), bf16),
        grid_spec=pltpu.PrefetchScalarGridSpec(
            num_scalar_prefetch=0,
            grid=(B, T // tq, T // tk),
            in_specs=[
                pl.BlockSpec((1, n_head, tq, hs), lambda b, qi, ki: (b, 0, qi, 0)),
                pl.BlockSpec((1, n_head, tk, hs), kv_index_map),
                pl.BlockSpec((1, n_head, tk, hs), kv_index_map),
            ],
            out_specs=pl.BlockSpec((1, tq, C), lambda b, qi, ki: (b, qi, 0)),
            scratch_shapes=[pltpu.VMEM((n_head, tq, 1), jnp.float32),    # m
                            pltpu.VMEM((n_head, tq, 1), jnp.float32),    # l
                            pltpu.VMEM((n_head, tq, hs), jnp.float32)],  # acc
        ),
        compiler_params=pltpu.CompilerParams(
            dimension_semantics=("parallel", "parallel", "arbitrary"),
            vmem_limit_bytes=vmem_limit),
    )(qh, kh, vh)

    # ---- 3) attn out-proj + residual + ln_2 + MLP + residual ----------------
    # NOTE: for GPT-2 medium/large/XL on v7x (64 MiB VMEM), stream wfc/wp2 over
    # a 4C grid axis (and/or single-buffer the invariant weight specs) instead
    # of keeping both MLP weights fully VMEM-resident.
    out = pl.pallas_call(
        _proj_mlp_kernel,
        out_shape=jax.ShapeDtypeStruct((B, T, C), x.dtype),
        grid_spec=pltpu.PrefetchScalarGridSpec(
            num_scalar_prefetch=0,
            grid=(B, T // tr),
            in_specs=[pl.BlockSpec((1, tr, C), lambda b, i: (b, i, 0)),
                      pl.BlockSpec((1, tr, C), lambda b, i: (b, i, 0)),
                      rep2(wpr.shape), rep2(bpr.shape),
                      rep2(g2.shape), rep2(b2.shape),
                      rep2(wfc.shape), rep2(bfc.shape),
                      rep2(wp2.shape), rep2(bp2.shape)],
            out_specs=pl.BlockSpec((1, tr, C), lambda b, i: (b, i, 0))),
        compiler_params=cp2,
    )(x, y, wpr, bpr, g2, b2, wfc, bfc, wp2, bp2)

    return out


# --------------------------- pure-JAX reference -------------------------------

def gpt2_block_ref(x, p, n_head):
    B, T, C = x.shape
    hs = C // n_head

    def ln(z, g, b, eps=1e-5):
        mu = jnp.mean(z, -1, keepdims=True)
        var = jnp.mean((z - mu) ** 2, -1, keepdims=True)
        return (z - mu) / jnp.sqrt(var + eps) * g + b

    h = ln(x, p["g1"], p["b1"])
    qkv = jnp.einsum("btc,cd->btd", h, p["wqkv"],
                     precision="highest") + p["bqkv"]
    q, k, v = jnp.split(qkv, 3, axis=-1)
    q = q.reshape(B, T, n_head, hs).transpose(0, 2, 1, 3)
    k = k.reshape(B, T, n_head, hs).transpose(0, 2, 1, 3)
    v = v.reshape(B, T, n_head, hs).transpose(0, 2, 1, 3)
    att = jnp.einsum("bhqd,bhkd->bhqk", q, k,
                     precision="highest") / math.sqrt(hs)
    mask = jnp.tril(jnp.ones((T, T), bool))
    att = jnp.where(mask, att, -jnp.inf)
    att = jax.nn.softmax(att, axis=-1)
    y = jnp.einsum("bhqk,bhkd->bhqd", att, v, precision="highest")
    y = y.transpose(0, 2, 1, 3).reshape(B, T, C)
    y = jnp.einsum("btc,cd->btd", y, p["wpr"], precision="highest") + p["bpr"]
    x = x + y

    h2 = ln(x, p["g2"], p["b2"])
    f = jnp.einsum("btc,cd->btd", h2, p["wfc"], precision="highest") + p["bfc"]
    c = math.sqrt(2.0 / math.pi)
    f = 0.5 * f * (1.0 + jnp.tanh(c * (f + 0.044715 * f ** 3)))
    m = jnp.einsum("btd,dc->btc", f, p["wp2"], precision="highest") + p["bp2"]
    return x + m


# ----------------------------------- main --------------------------------------

if __name__ == "__main__":
    B, T, C, n_head = 2, 8, 32, 4          # small shapes consistent with GPTConfig

    key = jax.random.PRNGKey(0)
    keys = jax.random.split(key, 8)
    std = 0.02

    params = {
        "g1":   jnp.ones((1, C), jnp.float32),
        "b1":   jnp.zeros((1, C), jnp.float32),
        "wqkv": jax.random.normal(keys[0], (C, 3 * C), jnp.float32) * std,
        "bqkv": jnp.zeros((1, 3 * C), jnp.float32),
        "wpr":  jax.random.normal(keys[1], (C, C), jnp.float32) * std,
        "bpr":  jnp.zeros((1, C), jnp.float32),
        "g2":   jnp.ones((1, C), jnp.float32),
        "b2":   jnp.zeros((1, C), jnp.float32),
        "wfc":  jax.random.normal(keys[2], (C, 4 * C), jnp.float32) * std,
        "bfc":  jnp.zeros((1, 4 * C), jnp.float32),
        "wp2":  jax.random.normal(keys[3], (4 * C, C), jnp.float32) * std,
        "bp2":  jnp.zeros((1, C), jnp.float32),
    }

    x = jax.random.normal(keys[4], (B, T, C), jnp.float32)

    out = jax.block_until_ready(gpt2_block(x, params, n_head))

    ref = gpt2_block_ref(x, params, n_head)
    assert out.shape == (B, T, C)
    max_err = float(jnp.max(jnp.abs(out - ref)))
    assert jnp.allclose(out, ref, rtol=1e-2, atol=1e-2), \
        f"mismatch vs reference (max abs err {max_err})"

    print("KERNEL_OK")
</pallas_src>

<mosaic_0001>
module attributes {stable_mosaic.version = 11 : i64} {
  func.func @_ln_qkv_kernel(%arg0: i32, %arg1: i32, %arg2: memref<1x8x32xf32, #tpu.memory_space<vmem>>, %arg3: memref<1x32xf32, #tpu.memory_space<vmem>>, %arg4: memref<1x32xf32, #tpu.memory_space<vmem>>, %arg5: memref<32x96xbf16, #tpu.memory_space<vmem>>, %arg6: memref<1x96xf32, #tpu.memory_space<vmem>>, %arg7: memref<1x4x8x8xbf16, #tpu.memory_space<vmem>>, %arg8: memref<1x4x8x8xbf16, #tpu.memory_space<vmem>>, %arg9: memref<1x4x8x8xbf16, #tpu.memory_space<vmem>>) attributes {dimension_semantics = [#tpu.dimension_semantics<parallel>, #tpu.dimension_semantics<parallel>], iteration_bounds = array<i64: 2, 1>, scalar_prefetch = 0 : i64, scratch_operands = 0 : i64, tpu.core_type = #tpu.core_type<tc>, window_params = [{transform_indices = @transform_0, window_bounds = array<i64: 1, 8, 32>}, {pipeline_mode = #tpu.pipeline_mode<synchronous>, transform_indices = @transform_1, window_bounds = array<i64: 1, 32>}, {pipeline_mode = #tpu.pipeline_mode<synchronous>, transform_indices = @transform_2, window_bounds = array<i64: 1, 32>}, {pipeline_mode = #tpu.pipeline_mode<synchronous>, transform_indices = @transform_3, window_bounds = array<i64: 32, 96>}, {pipeline_mode = #tpu.pipeline_mode<synchronous>, transform_indices = @transform_4, window_bounds = array<i64: 1, 96>}, {transform_indices = @transform_5, window_bounds = array<i64: 1, 4, 8, 8>}, {transform_indices = @transform_6, window_bounds = array<i64: 1, 4, 8, 8>}, {transform_indices = @transform_7, window_bounds = array<i64: 1, 4, 8, 8>}]} {
    %c0 = arith.constant 0 : index
    %c0_0 = arith.constant 0 : index
    %c0_1 = arith.constant 0 : index
    %0 = vector.load %arg2[%c0, %c0_0, %c0_1] : memref<1x8x32xf32, #tpu.memory_space<vmem>>, vector<1x8x32xf32>
    %1 = vector.shape_cast %0 : vector<1x8x32xf32> to vector<8x32xf32>
    %c0_2 = arith.constant 0 : index
    %c0_3 = arith.constant 0 : index
    %2 = vector.load %arg3[%c0_2, %c0_3] : memref<1x32xf32, #tpu.memory_space<vmem>>, vector<1x32xf32>
    %c0_4 = arith.constant 0 : index
    %c0_5 = arith.constant 0 : index
    %3 = vector.load %arg4[%c0_4, %c0_5] : memref<1x32xf32, #tpu.memory_space<vmem>>, vector<1x32xf32>
    %cst = arith.constant dense<0.000000e+00> : vector<8xf32>
    %4 = vector.multi_reduction <add>, %1, %cst [1] : vector<8x32xf32> to vector<8xf32>
    %5 = vector.shape_cast %4 : vector<8xf32> to vector<8x1xf32>
    %cst_6 = arith.constant 3.200000e+01 : f32
    %6 = vector.broadcast %cst_6 : f32 to vector<8x1xf32>
    %7 = arith.divf %5, %6 : vector<8x1xf32>
    %8 = vector.broadcast %7 : vector<8x1xf32> to vector<8x32xf32>
    %9 = arith.subf %1, %8 : vector<8x32xf32>
    %10 = arith.mulf %9, %9 : vector<8x32xf32>
    %cst_7 = arith.constant dense<0.000000e+00> : vector<8xf32>
    %11 = vector.multi_reduction <add>, %10, %cst_7 [1] : vector<8x32xf32> to vector<8xf32>
    %12 = vector.shape_cast %11 : vector<8xf32> to vector<8x1xf32>
    %cst_8 = arith.constant 3.200000e+01 : f32
    %13 = vector.broadcast %cst_8 : f32 to vector<8x1xf32>
    %14 = arith.divf %12, %13 : vector<8x1xf32>
    %15 = vector.broadcast %7 : vector<8x1xf32> to vector<8x32xf32>
    %16 = arith.subf %1, %15 : vector<8x32xf32>
    %cst_9 = arith.constant 9.99999974E-6 : f32
    %17 = vector.broadcast %cst_9 : f32 to vector<8x1xf32>
    %18 = arith.addf %14, %17 : vector<8x1xf32>
    %19 = math.rsqrt %18 : vector<8x1xf32>
    %20 = vector.broadcast %19 : vector<8x1xf32> to vector<8x32xf32>
    %21 = arith.mulf %16, %20 : vector<8x32xf32>
    %22 = vector.broadcast %2 : vector<1x32xf32> to vector<8x32xf32>
    %23 = arith.mulf %21, %22 : vector<8x32xf32>
    %24 = vector.broadcast %3 : vector<1x32xf32> to vector<8x32xf32>
    %25 = arith.addf %23, %24 : vector<8x32xf32>
    %26 = arith.truncf %25 : vector<8x32xf32> to vector<8x32xbf16>
    %c0_10 = arith.constant 0 : index
    %c0_11 = arith.constant 0 : index
    %27 = vector.load %arg5[%c0_10, %c0_11] : memref<32x96xbf16, #tpu.memory_space<vmem>>, vector<32x96xbf16>
    %cst_12 = arith.constant dense<0.000000e+00> : vector<8x96xf32>
    %28 = tpu.matmul %26, %27, %cst_12 {dimension_numbers = #tpu.dot_dimension_numbers<[1], [0], [0], [1], [0, 0, 1, 1], [], []>} : vector<8x32xbf16>, vector<32x96xbf16>, vector<8x96xf32> -> vector<8x96xf32>
    %c0_13 = arith.constant 0 : index
    %c0_14 = arith.constant 0 : index
    %29 = vector.load %arg6[%c0_13, %c0_14] : memref<1x96xf32, #tpu.memory_space<vmem>>, vector<1x96xf32>
    %30 = vector.broadcast %29 : vector<1x96xf32> to vector<8x96xf32>
    %31 = arith.addf %28, %30 : vector<8x96xf32>
    %32 = vector.extract_strided_slice %31 {offsets = [0, 0], sizes = [8, 8], strides = [1, 1]} : vector<8x96xf32> to vector<8x8xf32>
    %cst_15 = arith.constant 0.353553385 : f32
    %33 = vector.broadcast %cst_15 : f32 to vector<8x8xf32>
    %34 = arith.mulf %32, %33 : vector<8x8xf32>
    %35 = arith.truncf %34 : vector<8x8xf32> to vector<8x8xbf16>
    %c0_16 = arith.constant 0 : index
    %c0_17 = arith.constant 0 : index
    %c0_18 = arith.constant 0 : index
    %c0_19 = arith.constant 0 : index
    %36 = vector.load %arg7[%c0_16, %c0_17, %c0_18, %c0_19] : memref<1x4x8x8xbf16, #tpu.memory_space<vmem>>, vector<1x1x8x8xbf16>
    %37 = vector.shape_cast %36 : vector<1x1x8x8xbf16> to vector<8x8xbf16>
    %38 = vector.shape_cast %35 : vector<8x8xbf16> to vector<1x1x8x8xbf16>
    tpu.vector_store %arg7[%c0_16, %c0_17, %c0_18, %c0_19], %38 {strides = array<i32>} : memref<1x4x8x8xbf16, #tpu.memory_space<vmem>>, vector<1x1x8x8xbf16>,
    %39 = vector.extract_strided_slice %31 {offsets = [0, 32], sizes = [8, 8], strides = [1, 1]} : vector<8x96xf32> to vector<8x8xf32>
    %40 = arith.truncf %39 : vector<8x8xf32> to vector<8x8xbf16>
    %c0_20 = arith.constant 0 : index
    %c0_21 = arith.constant 0 : index
    %c0_22 = arith.constant 0 : index
    %c0_23 = arith.constant 0 : index
    %41 = vector.load %arg8[%c0_20, %c0_21, %c0_22, %c0_23] : memref<1x4x8x8xbf16, #tpu.memory_space<vmem>>, vector<1x1x8x8xbf16>
    %42 = vector.shape_cast %41 : vector<1x1x8x8xbf16> to vector<8x8xbf16>
    %43 = vector.shape_cast %40 : vector<8x8xbf16> to vector<1x1x8x8xbf16>
    tpu.vector_store %arg8[%c0_20, %c0_21, %c0_22, %c0_23], %43 {strides = array<i32>} : memref<1x4x8x8xbf16, #tpu.memory_space<vmem>>, vector<1x1x8x8xbf16>,
    %44 = vector.extract_strided_slice %31 {offsets = [0, 64], sizes = [8, 8], strides = [1, 1]} : vector<8x96xf32> to vector<8x8xf32>
    %45 = arith.truncf %44 : vector<8x8xf32> to vector<8x8xbf16>
    %c0_24 = arith.constant 0 : index
    %c0_25 = arith.constant 0 : index
    %c0_26 = arith.constant 0 : index
    %c0_27 = arith.constant 0 : index
    %46 = vector.load %arg9[%c0_24, %c0_25, %c0_26, %c0_27] : memref<1x4x8x8xbf16, #tpu.memory_space<vmem>>, vector<1x1x8x8xbf16>
    %47 = vector.shape_cast %46 : vector<1x1x8x8xbf16> to vector<8x8xbf16>
    %48 = vector.shape_cast %45 : vector<8x8xbf16> to vector<1x1x8x8xbf16>
    tpu.vector_store %arg9[%c0_24, %c0_25, %c0_26, %c0_27], %48 {strides = array<i32>} : memref<1x4x8x8xbf16, #tpu.memory_space<vmem>>, vector<1x1x8x8xbf16>,
    %49 = vector.extract_strided_slice %31 {offsets = [0, 8], sizes = [8, 8], strides = [1, 1]} : vector<8x96xf32> to vector<8x8xf32>
    %cst_28 = arith.constant 0.353553385 : f32
    %50 = vector.broadcast %cst_28 : f32 to vector<8x8xf32>
    %51 = arith.mulf %49, %50 : vector<8x8xf32>
    %52 = arith.truncf %51 : vector<8x8xf32> to vector<8x8xbf16>
    %c0_29 = arith.constant 0 : index
    %c1 = arith.constant 1 : index
    %c0_30 = arith.constant 0 : index
    %c0_31 = arith.constant 0 : index
    %53 = vector.load %arg7[%c0_29, %c1, %c0_30, %c0_31] : memref<1x4x8x8xbf16, #tpu.memory_space<vmem>>, vector<1x1x8x8xbf16>
    %54 = vector.shape_cast %53 : vector<1x1x8x8xbf16> to vector<8x8xbf16>
    %55 = vector.shape_cast %52 : vector<8x8xbf16> to vector<1x1x8x8xbf16>
    tpu.vector_store %arg7[%c0_29, %c1, %c0_30, %c0_31], %55 {strides = array<i32>} : memref<1x4x8x8xbf16, #tpu.memory_space<vmem>>, vector<1x1x8x8xbf16>,
    %56 = vector.extract_strided_slice %31 {offsets = [0, 40], sizes = [8, 8], strides = [1, 1]} : vector<8x96xf32> to vector<8x8xf32>
    %57 = arith.truncf %56 : vector<8x8xf32> to vector<8x8xbf16>
    %c0_32 = arith.constant 0 : index
    %c1_33 = arith.constant 1 : index
    %c0_34 = arith.constant 0 : index
    %c0_35 = arith.constant 0 : index
    %58 = vector.load %arg8[%c0_32, %c1_33, %c0_34, %c0_35] : memref<1x4x8x8xbf16, #tpu.memory_space<vmem>>, vector<1x1x8x8xbf16>
    %59 = vector.shape_cast %58 : vector<1x1x8x8xbf16> to vector<8x8xbf16>
    %60 = vector.shape_cast %57 : vector<8x8xbf16> to vector<1x1x8x8xbf16>
    tpu.vector_store %arg8[%c0_32, %c1_33, %c0_34, %c0_35], %60 {strides = array<i32>} : memref<1x4x8x8xbf16, #tpu.memory_space<vmem>>, vector<1x1x8x8xbf16>,
    %61 = vector.extract_strided_slice %31 {offsets = [0, 72], sizes = [8, 8], strides = [1, 1]} : vector<8x96xf32> to vector<8x8xf32>
    %62 = arith.truncf %61 : vector<8x8xf32> to vector<8x8xbf16>
    %c0_36 = arith.constant 0 : index
    %c1_37 = arith.constant 1 : index
    %c0_38 = arith.constant 0 : index
    %c0_39 = arith.constant 0 : index
    %63 = vector.load %arg9[%c0_36, %c1_37, %c0_38, %c0_39] : memref<1x4x8x8xbf16, #tpu.memory_space<vmem>>, vector<1x1x8x8xbf16>
    %64 = vector.shape_cast %63 : vector<1x1x8x8xbf16> to vector<8x8xbf16>
    %65 = vector.shape_cast %62 : vector<8x8xbf16> to vector<1x1x8x8xbf16>
    tpu.vector_store %arg9[%c0_36, %c1_37, %c0_38, %c0_39], %65 {strides = array<i32>} : memref<1x4x8x8xbf16, #tpu.memory_space<vmem>>, vector<1x1x8x8xbf16>,
    %66 = vector.extract_strided_slice %31 {offsets = [0, 16], sizes = [8, 8], strides = [1, 1]} : vector<8x96xf32> to vector<8x8xf32>
    %cst_40 = arith.constant 0.353553385 : f32
    %67 = vector.broadcast %cst_40 : f32 to vector<8x8xf32>
    %68 = arith.mulf %66, %67 : vector<8x8xf32>
    %69 = arith.truncf %68 : vector<8x8xf32> to vector<8x8xbf16>
    %c0_41 = arith.constant 0 : index
    %c2 = arith.constant 2 : index
    %c0_42 = arith.constant 0 : index
    %c0_43 = arith.constant 0 : index
    %70 = vector.load %arg7[%c0_41, %c2, %c0_42, %c0_43] : memref<1x4x8x8xbf16, #tpu.memory_space<vmem>>, vector<1x1x8x8xbf16>
    %71 = vector.shape_cast %70 : vector<1x1x8x8xbf16> to vector<8x8xbf16>
    %72 = vector.shape_cast %69 : vector<8x8xbf16> to vector<1x1x8x8xbf16>
    tpu.vector_store %arg7[%c0_41, %c2, %c0_42, %c0_43], %72 {strides = array<i32>} : memref<1x4x8x8xbf16, #tpu.memory_space<vmem>>, vector<1x1x8x8xbf16>,
    %73 = vector.extract_strided_slice %31 {offsets = [0, 48], sizes = [8, 8], strides = [1, 1]} : vector<8x96xf32> to vector<8x8xf32>
    %74 = arith.truncf %73 : vector<8x8xf32> to vector<8x8xbf16>
    %c0_44 = arith.constant 0 : index
    %c2_45 = arith.constant 2 : index
    %c0_46 = arith.constant 0 : index
    %c0_47 = arith.constant 0 : index
    %75 = vector.load %arg8[%c0_44, %c2_45, %c0_46, %c0_47] : memref<1x4x8x8xbf16, #tpu.memory_space<vmem>>, vector<1x1x8x8xbf16>
    %76 = vector.shape_cast %75 : vector<1x1x8x8xbf16> to vector<8x8xbf16>
    %77 = vector.shape_cast %74 : vector<8x8xbf16> to vector<1x1x8x8xbf16>
    tpu.vector_store %arg8[%c0_44, %c2_45, %c0_46, %c0_47], %77 {strides = array<i32>} : memref<1x4x8x8xbf16, #tpu.memory_space<vmem>>, vector<1x1x8x8xbf16>,
    %78 = vector.extract_strided_slice %31 {offsets = [0, 80], sizes = [8, 8], strides = [1, 1]} : vector<8x96xf32> to vector<8x8xf32>
    %79 = arith.truncf %78 : vector<8x8xf32> to vector<8x8xbf16>
    %c0_48 = arith.constant 0 : index
    %c2_49 = arith.constant 2 : index
    %c0_50 = arith.constant 0 : index
    %c0_51 = arith.constant 0 : index
    %80 = vector.load %arg9[%c0_48, %c2_49, %c0_50, %c0_51] : memref<1x4x8x8xbf16, #tpu.memory_space<vmem>>, vector<1x1x8x8xbf16>
    %81 = vector.shape_cast %80 : vector<1x1x8x8xbf16> to vector<8x8xbf16>
    %82 = vector.shape_cast %79 : vector<8x8xbf16> to vector<1x1x8x8xbf16>
    tpu.vector_store %arg9[%c0_48, %c2_49, %c0_50, %c0_51], %82 {strides = array<i32>} : memref<1x4x8x8xbf16, #tpu.memory_space<vmem>>, vector<1x1x8x8xbf16>,
    %83 = vector.extract_strided_slice %31 {offsets = [0, 24], sizes = [8, 8], strides = [1, 1]} : vector<8x96xf32> to vector<8x8xf32>
    %cst_52 = arith.constant 0.353553385 : f32
    %84 = vector.broadcast %cst_52 : f32 to vector<8x8xf32>
    %85 = arith.mulf %83, %84 : vector<8x8xf32>
    %86 = arith.truncf %85 : vector<8x8xf32> to vector<8x8xbf16>
    %c0_53 = arith.constant 0 : index
    %c3 = arith.constant 3 : index
    %c0_54 = arith.constant 0 : index
    %c0_55 = arith.constant 0 : index
    %87 = vector.load %arg7[%c0_53, %c3, %c0_54, %c0_55] : memref<1x4x8x8xbf16, #tpu.memory_space<vmem>>, vector<1x1x8x8xbf16>
    %88 = vector.shape_cast %87 : vector<1x1x8x8xbf16> to vector<8x8xbf16>
    %89 = vector.shape_cast %86 : vector<8x8xbf16> to vector<1x1x8x8xbf16>
    tpu.vector_store %arg7[%c0_53, %c3, %c0_54, %c0_55], %89 {strides = array<i32>} : memref<1x4x8x8xbf16, #tpu.memory_space<vmem>>, vector<1x1x8x8xbf16>,
    %90 = vector.extract_strided_slice %31 {offsets = [0, 56], sizes = [8, 8], strides = [1, 1]} : vector<8x96xf32> to vector<8x8xf32>
    %91 = arith.truncf %90 : vector<8x8xf32> to vector<8x8xbf16>
    %c0_56 = arith.constant 0 : index
    %c3_57 = arith.constant 3 : index
    %c0_58 = arith.constant 0 : index
    %c0_59 = arith.constant 0 : index
    %92 = vector.load %arg8[%c0_56, %c3_57, %c0_58, %c0_59] : memref<1x4x8x8xbf16, #tpu.memory_space<vmem>>, vector<1x1x8x8xbf16>
    %93 = vector.shape_cast %92 : vector<1x1x8x8xbf16> to vector<8x8xbf16>
    %94 = vector.shape_cast %91 : vector<8x8xbf16> to vector<1x1x8x8xbf16>
    tpu.vector_store %arg8[%c0_56, %c3_57, %c0_58, %c0_59], %94 {strides = array<i32>} : memref<1x4x8x8xbf16, #tpu.memory_space<vmem>>, vector<1x1x8x8xbf16>,
    %95 = vector.extract_strided_slice %31 {offsets = [0, 88], sizes = [8, 8], strides = [1, 1]} : vector<8x96xf32> to vector<8x8xf32>
    %96 = arith.truncf %95 : vector<8x8xf32> to vector<8x8xbf16>
    %c0_60 = arith.constant 0 : index
    %c3_61 = arith.constant 3 : index
    %c0_62 = arith.constant 0 : index
    %c0_63 = arith.constant 0 : index
    %97 = vector.load %arg9[%c0_60, %c3_61, %c0_62, %c0_63] : memref<1x4x8x8xbf16, #tpu.memory_space<vmem>>, vector<1x1x8x8xbf16>
    %98 = vector.shape_cast %97 : vector<1x1x8x8xbf16> to vector<8x8xbf16>
    %99 = vector.shape_cast %96 : vector<8x8xbf16> to vector<1x1x8x8xbf16>
    tpu.vector_store %arg9[%c0_60, %c3_61, %c0_62, %c0_63], %99 {strides = array<i32>} : memref<1x4x8x8xbf16, #tpu.memory_space<vmem>>, vector<1x1x8x8xbf16>,
    return
  }
  func.func @transform_0(%arg0: i32, %arg1: i32) -> (i32, i32, i32) {
    %c0_i32 = arith.constant 0 : i32
    %c0_i32_0 = arith.constant 0 : i32
    return %arg0, %arg1, %c0_i32 : i32, i32, i32
  }
  func.func @transform_1(%arg0: i32, %arg1: i32) -> (i32, i32) {
    %c0_i32 = arith.constant 0 : i32
    %c0_i32_0 = arith.constant 0 : i32
    %c0_i32_1 = arith.constant 0 : i32
    return %c0_i32, %c0_i32_0 : i32, i32
  }
  func.func @transform_2(%arg0: i32, %arg1: i32) -> (i32, i32) {
    %c0_i32 = arith.constant 0 : i32
    %c0_i32_0 = arith.constant 0 : i32
    %c0_i32_1 = arith.constant 0 : i32
    return %c0_i32, %c0_i32_0 : i32, i32
  }
  func.func @transform_3(%arg0: i32, %arg1: i32) -> (i32, i32) {
    %c0_i32 = arith.constant 0 : i32
    %c0_i32_0 = arith.constant 0 : i32
    %c0_i32_1 = arith.constant 0 : i32
    return %c0_i32, %c0_i32_0 : i32, i32
  }
  func.func @transform_4(%arg0: i32, %arg1: i32) -> (i32, i32) {
    %c0_i32 = arith.constant 0 : i32
    %c0_i32_0 = arith.constant 0 : i32
    %c0_i32_1 = arith.constant 0 : i32
    return %c0_i32, %c0_i32_0 : i32, i32
  }
  func.func @transform_5(%arg0: i32, %arg1: i32) -> (i32, i32, i32, i32) {
    %c0_i32 = arith.constant 0 : i32
    %c0_i32_0 = arith.constant 0 : i32
    %c0_i32_1 = arith.constant 0 : i32
    return %arg0, %c0_i32, %arg1, %c0_i32_0 : i32, i32, i32, i32
  }
  func.func @transform_6(%arg0: i32, %arg1: i32) -> (i32, i32, i32, i32) {
    %c0_i32 = arith.constant 0 : i32
    %c0_i32_0 = arith.constant 0 : i32
    %c0_i32_1 = arith.constant 0 : i32
    return %arg0, %c0_i32, %arg1, %c0_i32_0 : i32, i32, i32, i32
  }
  func.func @transform_7(%arg0: i32, %arg1: i32) -> (i32, i32, i32, i32) {
    %c0_i32 = arith.constant 0 : i32
    %c0_i32_0 = arith.constant 0 : i32
    %c0_i32_1 = arith.constant 0 : i32
    return %arg0, %c0_i32, %arg1, %c0_i32_0 : i32, i32, i32, i32
  }
}

</mosaic_0001>

<bundles_post_ra>
// kernel: tpu_custom_call.1
= control target key start
LH: loop header
LB: loop body
LE: loop exit
PB: predicated region body
PF: predicated region fallthrough
CT: control target
= control target key end

     0   :  { %s1436_s0 = inlined_call_operand.hbm [shape: f32[2,8,32], index: 0, kind: input, shape index: {}]   ;;  %s1437_s1 = inlined_call_operand.hbm [shape: f32[1,32], index: 1, kind: input, shape index: {}]   ;;  %s1438_s2 = inlined_call_operand.vmem [shape: f32[1,32], index: 2, kind: input, shape index: {}]   ;;  %s1439_s3 = inlined_call_operand.hbm [shape: bf16[32,96], index: 3, kind: input, shape index: {}]   ;;  %s1440_s4 = inlined_call_operand.vmem [shape: f32[1,96], index: 4, kind: input, shape index: {}]   ;;  %s1441_s5 = inlined_call_operand.hbm [shape: bf16[2,4,8,8], index: 5, kind: output, shape index: {0}]   ;;  %s1442_s6 = inlined_call_operand.hbm [shape: bf16[2,4,8,8], index: 6, kind: output, shape index: {1}]   ;;  %s1443_s7 = inlined_call_operand.hbm [shape: bf16[2,4,8,8], index: 7, kind: output, shape index: {2}]  }
   0x1   :  { %1447 = sst [smem:[#allocation16_spill]] %s1436_s0 }
   0x2   :  { %1448 = sst [smem:[#allocation17_spill]] %s1437_s1 }
   0x3   :  { %1449 = sst [smem:[#allocation18_spill]] %s1438_s2 }
   0x4   :  { %1450 = sst [smem:[#allocation19_spill]] %s1439_s3 }
   0x5   :  { %13 = vsyncpa [#allocation3], 0 }
   0x6   :  { %15 = vsyncpa [#allocation3 + $0x1], 0 }
   0x7   :  { %16 = vsyncpa [#allocation6], 0 }
   0x8   :  { %17 = vsyncpa [#allocation4], 0 }
   0x9   :  { %19 = vsyncpa [#allocation4 + $0x1], 0 }
   0xa   :  { %20 = vsyncpa [#allocation10], 0 }
   0xb   :  { %22 = vsyncpa [#allocation10 + $0x1], 0  ;;  %s1197_s24 = smov 0   ;;  %s1199_s25 = smov 0  }
   0xc   :  { %s1201_s26 = smov 0   ;;  %s1203_s27 = smov 0  }
   0xd   :  { %s1205_s28 = smov 0   ;;  %s1207_s29 = smov 0  }
   0xe LB: > { %s1228_s30 = sadd.s32 4294967295, %s1138_s29   ;;  %s1444_s8 = sadd.s32 4294967294, %s1138_s29   ;;  %s1138_s29 = sphi %s1207_s29, %s28_s29   ;;  %s1134_s28 = sphi %s1205_s28, %s1465_s28   ;;  %s1130_s27 = sphi %s1203_s27, %s1464_s27   ;;  %s1126_s26 = sphi %s1201_s26, %s1463_s26   ;;  %s1122_s25 = sphi %s1199_s25, %s1462_s25   ;;  %s1118_s24 = sphi %s1197_s24, %s1461_s24  }
   0xf   : > { %p62_p0 = scmp.ne.s32.totalorder %s1122_s25, %s1118_s24  ;;  %p63_p1 = scmp.eq.s32.totalorder %s1228_s30, 0 }
  0x10   : > { %p178_p2 = scmp.eq.s32.totalorder %s1444_s8, 1  ;;  %p740_p4 = scmp.ge.s32.totalorder %s1138_s29, 1 }
  0x11   : > { %p1238_p3 = por %p63_p1, %p62_p0  ;;  %p241_p6 = scmp.lt.s32.totalorder %s1138_s29, 3 }
  0x12   : > { %p1243_p5 = por %p178_p2, %p62_p0  ;;  %s1453_s1 = sld [smem:[#allocation17_spill]] }
  0x13   : > { %p1251_p7 = pnand %p740_p4, %p241_p6  ;;  %p743_p8 = scmp.ge.s32.totalorder %s1138_s29, 2 }
  0x14   : > { %s1140_s15 = smov [#allocation5]   ;;  %s1455_s3 = sld [smem:[#allocation19_spill]] }
  0x15   : > { %p803_p9 = pneg %p1251_p7  ;;  %s255_s16 = sshll.u32 %s1140_s15, 4  ;;  %s256_s16 = int_to_ptr.vmem [resolvable:$true] %s255_s16 }
  0x16   : > { %s1141_s20 = smov [#allocation7]   ;;  %s1142_s22 = smov 64  }
  0x17   : > { %p804_p10 = pnand %p803_p9, %p63_p1  ;;  %s269_s21 = sshll.u32 %s1141_s20, 4  ;;  %s270_s21 = int_to_ptr.vmem [resolvable:$true] %s269_s21 }
  0x18   : > { %s253_s13 = sshll.u32 %s1453_s1, 4  ;;  %s1143_s23 = smov 4   ;;  %s254_s13 = int_to_ptr.hbm [resolvable:$true] %s253_s13 }
  0x19   : > { %806 = dma.hbm_to_vmem [thread:$0]  (!%p804_p10), %s254_s13, 16, %s256_s16, [#allocation6]  }
  0x1a   : > { %s267_s19 = sshll.u32 %s1455_s3, 4  ;;  %p172_p11 = scmp.eq.s32.totalorder %s1228_s30, 1  ;;  %s268_s19 = int_to_ptr.hbm [resolvable:$true] %s267_s19 }
  0x1b   : > { %809 = dma.hbm_to_vmem [thread:$0]  (!%p804_p10), %s268_s19, 256, %s270_s21, [#allocation6], %s1142_s22, %s1142_s22, %s1143_s23  }
  0x1c   : > { %s40_s11 = sadd.s32 1, %s1134_s28  ;;  %s49_s12 = sadd.s32 1, %s1126_s26 }
  0x1d   : > { %p42_p12 = scmp.ge.s32.totalorder %s40_s11, 2  ;;  %p56_p13 = scmp.ne.s32.totalorder %s1126_s26, %s1122_s25 }
  0x1e   : > { %p57_p0 = scmp.eq.s32.totalorder %s1138_s29, 0  ;;  %p826_p4 = scmp.lt.s32.totalorder %s1138_s29, 2 }
  0x1f   : > { %s1467_s11 = smov (%p42_p12, %s40_s11), 0  ;;  %p1271_p2 = por %p172_p11, %p56_p13 }
  0x20   : > { %s44_s13 = ssub.s32 %s1134_s28, %s1467_s11  ;;  %s286_s16 = sand.u32 1, %s1126_s26  }
  0x21   : > { %p47_p6 = scmp.eq.s32.totalorder %s44_s13, 0  ;;  %p58_p9 = por %p57_p0, %p56_p13 }
  0x22   : > { %s744_s17 = sshll.u32 %s286_s16, 3  ;;  %s745_s18 = sshll.u32 %s1134_s28, 3 }
  0x23   : > { %s1281_s19 = scalar_select %p47_p6, %s1126_s26, %s49_s12  }
  0x24   : > { %s1457_s0 = sld [smem:[#allocation16_spill]]  ;;  %s290_s8 = scalar_lea.vmem [#allocation2], %s744_s17 }
  0x25   : > { %s299_s1 = sshll.u32 %s290_s8, 4  ;;  %p811_p10 = pnand %p826_p4, %p58_p9  ;;  %s300_s1 = int_to_ptr.vmem [resolvable:$true] %s299_s1 }
  0x26   : > { %s287_s3 = scalar_lea.sflag [#allocation3], %s286_s16  ;;  %s1291_s12 = sand.u32 (!%p1251_p7), 1, %s1122_s25  }
  0x27   : > { %s747_s13 = sshll.u32 (!%p1251_p7), %s1291_s12, 3 }
  0x28   : > { %308 = sbr.rel (%p1251_p7) target bundleno = 608 (0x260), region = 40  ;;  %s314_s20 = scalar_lea.vmem (!%p1251_p7), [#allocation2], %s747_s13 }
  0x2a   : > { %s295_s22 = scalar_lea.hbm %s1457_s0, %s745_s18  ;;  %s311_s18 = scalar_lea.sflag (!%p1251_p7), [#allocation3], %s1291_s12 }
  0x2b   : > { %s297_s23 = sshll.u32 %s295_s22, 4  ;;  %s298_s23 = int_to_ptr.hbm [resolvable:$true] %s297_s23 }
  0x2c   : > { %813 = dma.hbm_to_vmem [thread:$0]  (!%p811_p10), %s298_s23, 128, %s300_s1, %s287_s3  }
  0x2d   : > { %1101 = dma.done.wait (%p1238_p3), %s311_s18, 128  }
  0x2e   : > { %1103 = vsyncadd (%p1238_p3), %s311_s18, 4294967168 }
  0x2f   : > { %1105 = dma.done.wait (%p63_p1), [#allocation6], 272  }
  0x30   : > { %1107 = vsyncadd (%p63_p1), [#allocation6], 4294967024  ;;  %vm370_vm0 = vcmask 261120   ;;  %v367_v0 = vld [vmem:[%s314_s20] sm:$0xff]  ;;  %v1144_v2 = vmov 32.0   ;;  %v782_v15 = vld [vmem:[#allocation7] sm:$0xff] }
  0x31   : > { %v371_v1 = vsel %vm370_vm0, %v367_v0, 0.0  ;;  %898 = vrcp.f32 %v1144_v2  ;;  %v783_v14 = vld [vmem:[#allocation7 + $0x8] sm:$0xff]  ;;  %v895_v25 = vld [vmem:[#allocation5] ss:$0 sm:$0xff]  ;;  %s1458_s2 = sld [smem:[#allocation18_spill]]  ;;  %s1313_s14 = sshll.u32 %s1291_s12, 4 }
  0x32   : > { %372 = vadd.xlane.f32.xlu0 %v371_v1  ;;  %438 = vmatpush.bf16.msra.mxu0 %v783_v14  ;;  %v897_v32 = vld [vmem:[%s1440_s4] ss:$0 sm:$0xff]  ;;  %vm447_vm5 = vcmask 60416   ;;  %s1445_s16 = smov 64   ;;  %s1146_s17 = smov 80  }
  0x33   : > { %s1147_s21 = smov 96   ;;  %s1317_s22 = scalar_lea.vmem [#allocation8], %s1313_s14 }
  0x34   : > { %s1148_s23 = smov 72   ;;  %s1149_s13 = smov 88  }
  0x35   : > { %s1150_s18 = smov 56   ;;  %s1151_s20 = smov 120  }
  0x36   : > { %439 = vmatpush.bf16.msra.mxu0 %v782_v15  ;;  %s1152_s1 = smov 48   ;;  %s1153_s3 = smov 112  }
  0x37   : > { %v899_v3 = vpop.eup %898  ;;  %v896_v28 = vld [vmem:[%s1458_s2] ss:$0 sm:$0xff]  ;;  %s1154_s8 = smov 40   ;;  %s1155_s9 = smov 104  }
  0x38   : > { %v375_v4 = vmul.f32 32.0, %v899_v3  ;;  %vm379_vm1 = vweird.f32 %v899_v3 }
  0x3a   : > { %v376_v5 = vsub.f32 1.0, %v375_v4 }
  0x3c   : > { %v377_v6 = vmul.f32 %v899_v3, %v376_v5 }
  0x3e   : > { %v378_v7 = vadd.f32 %v899_v3, %v377_v6 }
  0x40   : > { %v380_v8 = vsel %vm379_vm1, %v899_v3, %v378_v7 }
  0xa5   : > { %v373_v9 = vpop.xlane.xlu0 %372 }
  0xa6   : > { %v381_v10 = vmul.f32 %v380_v8, %v373_v9 }
  0xa8   : > { %v382_v11 = vsub.f32 %v367_v0, %v381_v10 }
  0xaa   : > { %v383_v12 = vmul.f32 %v382_v11, %v382_v11 }
  0xac   : > { %v384_v13 = vsel %vm370_vm0, %v383_v12, 0.0 }
  0xad   : > { %385 = vadd.xlane.f32.xlu0 %v384_v13 }
 0x120   : > { %v386_v16 = vpop.xlane.xlu0 %385 }
 0x121   : > { %v387_v17 = vmul.f32 %v386_v16, %v380_v8 }
 0x123   : > { %v388_v18 = vadd.f32 1e-05, %v387_v17 }
 0x125   : > { %900 = vrsqrt.f32 %v388_v18  ;;  %vm395_vm3 = vweird.f32 %v388_v18 }
 0x12b   : > { %v901_v19 = vpop.eup %900 }
 0x12c   : > { %v390_v20 = vmul.f32 %v901_v19, %v388_v18  ;;  %vm396_vm2 = vweird.f32 %v901_v19 }
 0x12d   : > { %vm397_vm4 = vmor %vm395_vm3, %vm396_vm2 }
 0x12e   : > { %v391_v21 = vmul.f32 %v901_v19, %v390_v20 }
 0x130   : > { %v392_v22 = vmul.f32 0.5, %v391_v21 }
 0x132   : > { %v393_v23 = vsub.f32 1.5, %v392_v22 }
 0x134   : > { %v394_v24 = vmul.f32 %v901_v19, %v393_v23 }
 0x136   : > { %v398_v26 = vsel %vm397_vm4, %v901_v19, %v394_v24 }
 0x137   : > { %v399_v27 = vmul.f32 %v398_v26, %v382_v11 }
 0x139   : > { %v403_v29 = vmul.f32 %v895_v25, %v399_v27 }
 0x13b   : > { %v407_v30 = vadd.f32 %v896_v28, %v403_v29 }
 0x13d   : > { %v408_v31 = vpack.c.bf16 %v407_v30, %v407_v30 }
 0x13f   : > { %761 = vmatmul.msk.bf16.vlgmr.msra.gmra.mxu0 %vm370_vm0, %v408_v31 }
 0x1bc   : > { %v441_v33 = vpop.f32.mrf.mxu0 }
 0x1bd   : > { %v442_v34 = vadd.f32 %v897_v32, %v441_v33 }
 0x1bf   : > { %v445_v35 = vmul.f32 0.35355338, %v442_v34  ;;  %v449_v36 = vpack.c.bf16 %v442_v34, %v442_v34 }
 0x1c1   : > { %v446_v37 = vpack.c.bf16 %v445_v35, %v445_v35  ;;  %455 = vrot.lane.b32.xlu0 %v449_v36, %s1445_s16  ;;  %480 = vrot.lane.b32.xlu2 %v449_v36, %s1146_s17  ;;  %s358_s17 = scalar_lea.vmem [#allocation9], %s1313_s14 }
 0x1c2   : > { %451 = vrot.lane.b32.xlu1 %v449_v36, %s1147_s21  ;;  %s365_s21 = scalar_lea.vmem [#allocation11], %s1313_s14 }
 0x1c3   : > { %448 = vst.msk [vmem:[%s1317_s22] sm:$0xf] %vm447_vm5, %v446_v37  ;;  %s565_s16 = sshll.u32 %s365_s21, 4  ;;  %s1346_s16 = int_to_ptr.vmem [resolvable:$true] %s565_s16 }
 0x1c4   : > { %v443_v38 = vpop.f32.mrf.mxu0 }
 0x1c9   : > { %495 = vrot.lane.b32.xlu2 %v449_v36, %s1148_s23  ;;  %s1327_s23 = sshll.u32 %s1130_s27, 4 }
 0x1ca   : > { %465 = vrot.lane.b32.xlu1 %v449_v36, %s1149_s13  ;;  %s564_s27 = scalar_lea.hbm %s1443_s7, %s1327_s23 }
 0x1cb   : > { %s1343_s0 = sshll.u32 %s564_s27, 4  ;;  %s568_s0 = int_to_ptr.hbm [resolvable:$true] %s1343_s0 }
 0x1d1   : > { %470 = vrot.lane.b32.xlu2 %v449_v36, %s1150_s18 }
 0x1d2   : > { %460 = vrot.lane.b32.xlu1 %v446_v37, %s1151_s20  ;;  %s546_s20 = scalar_lea.hbm %s1442_s6, %s1327_s23 }
 0x1d9   : > { %485 = vrot.lane.b32.xlu2 %v449_v36, %s1152_s1  ;;  %s1012_s1 = scalar_lea.hbm %s1442_s6, 32 }
 0x1da   : > { %475 = vrot.lane.b32.xlu1 %v446_v37, %s1153_s3  ;;  %s547_s3 = sshll.u32 %s358_s17, 4  ;;  %s548_s3 = int_to_ptr.vmem [resolvable:$true] %s547_s3 }
 0x1e1   : > { %500 = vrot.lane.b32.xlu2 %v449_v36, %s1154_s8  ;;  %s510_s8 = sand.u32 1, %s1228_s30  }
 0x1e2   : > { %490 = vrot.lane.b32.xlu1 %v446_v37, %s1155_s9  ;;  %s1341_s9 = sshll.u32 %s546_s20, 4  ;;  %s1351_s30 = scalar_lea.sflag [#allocation10], %s510_s8  ;;  %s550_s9 = int_to_ptr.hbm [resolvable:$true] %s1341_s9 }
 0x1e3   : > { %s1006_s13 = sshra.s32 %s550_s9, 4  ;;  %s1007_s13 = int_to_ptr.hbm [resolvable:$true] %s1006_s13 }
 0x1e4   : > { %s1008_s18 = scalar_lea.hbm %s1007_s13, 16  ;;  %p1013_p11 = scmp.lt.s32.totalorder %s1007_s13, %s1442_s6 }
 0x1e5   : > { %p1009_p1 = scmp.ne.s32.totalorder %s1007_s13, %s1008_s18  ;;  %p1014_p12 = scmp.lt.s32.totalorder %s1012_s1, %s1008_s18 }
 0x1e7   : > { %p1010_p3 = pnand %p1009_p1, %p1271_p2  ;;  %p1015_p13 = por %p1014_p12, %p1013_p11 }
 0x1e9   : > { %p1011_p7 = pneg %p1010_p3 }
 0x1eb   : > { %p1016_p0 = pnand %p1015_p13, %p1011_p7 }
 0x21b   : > { %v481_v39 = vpop.permute.xlu2 %480 }
 0x21c   : > { %766 = vst.msk [vmem:[%s358_s17 + $0x8] sm:$0xf] %vm447_vm5, %v481_v39 }
 0x223   : > { %v496_v40 = vpop.permute.xlu2 %495 }
 0x224   : > { %769 = vst.msk [vmem:[%s358_s17 + $0xc] sm:$0xf] %vm447_vm5, %v496_v40 }
 0x22b   : > { %v471_v41 = vpop.permute.xlu2 %470 }
 0x22c   : > { %764 = vst.msk [vmem:[%s365_s21 + $0x4] sm:$0xf] %vm447_vm5, %v471_v41 }
 0x233   : > { %v456_v42 = vpop.permute.xlu0 %455  ;;  %v486_v43 = vpop.permute.xlu2 %485 }
 0x234   : > { %458 = vst.msk [vmem:[%s365_s21] sm:$0xf] %vm447_vm5, %v456_v42  ;;  %v452_v44 = vpop.permute.xlu1 %451 }
 0x235   : > { %767 = vst.msk [vmem:[%s365_s21 + $0x8] sm:$0xf] %vm447_vm5, %v486_v43 }
 0x236   : > { %454 = vst.msk [vmem:[%s358_s17] sm:$0xf] %vm447_vm5, %v452_v44 }
 0x23b   : > { %v501_v45 = vpop.permute.xlu2 %500 }
 0x23c   : > { %770 = vst.msk [vmem:[%s365_s21 + $0xc] sm:$0xf] %vm447_vm5, %v501_v45  ;;  %v466_v46 = vpop.permute.xlu1 %465 }
 0x23d   : > { %763 = vst.msk [vmem:[%s358_s17 + $0x4] sm:$0xf] %vm447_vm5, %v466_v46 }
 0x23e   : > { %1019 = shalt.err (!%p1016_p0)
}
 0x23f   : > { %s1156_s17 = smov 4   ;;  %s1459_s21 = smov 64  }
 0x240   : > { %798 = dma.vmem_to_hbm [thread:$0]  (%p1271_p2), %s548_s3, 256, %s550_s9, %s1351_s30, %s1459_s21, %s1459_s21, %s1156_s17  }
 0x241   : > { %s1034_s8 = sshra.s32 %s568_s0, 4  ;;  %s1040_s18 = scalar_lea.hbm %s1443_s7, 32  ;;  %s1035_s8 = int_to_ptr.hbm [resolvable:$true] %s1034_s8 }
 0x242   : > { %s1036_s20 = scalar_lea.hbm %s1035_s8, 16  ;;  %p1041_p10 = scmp.lt.s32.totalorder %s1035_s8, %s1443_s7 }
 0x243   : > { %p1037_p4 = scmp.ne.s32.totalorder %s1035_s8, %s1036_s20  ;;  %p1042_p1 = scmp.lt.s32.totalorder %s1040_s18, %s1036_s20 }
 0x245   : > { %p1038_p6 = pnand %p1037_p4, %p1271_p2  ;;  %p1043_p3 = por %p1042_p1, %p1041_p10 }
 0x247   : > { %p1039_p9 = pneg %p1038_p6 }
 0x249   : > { %p1044_p7 = pnand %p1043_p3, %p1039_p9 }
 0x24b   : > { %1047 = shalt.err (!%p1044_p7)
}
 0x24c   : > { %799 = dma.vmem_to_hbm [thread:$0]  (%p1271_p2), %s1346_s16, 256, %s568_s0, %s1351_s30, %s1459_s21, %s1459_s21, %s1156_s17   ;;  %v461_v47 = vpop.permute.xlu1 %460 }
 0x24d   : > { %762 = vst.msk [vmem:[%s1317_s22 + $0x4] sm:$0xf] %vm447_vm5, %v461_v47  ;;  %s528_s27 = scalar_lea.hbm %s1441_s5, %s1327_s23  ;;  %s529_s8 = sshll.u32 %s1317_s22, 4  ;;  %s530_s8 = int_to_ptr.vmem [resolvable:$true] %s529_s8 }
 0x24e   : > { %s531_s20 = sshll.u32 %s528_s27, 4  ;;  %s506_s2 = scalar_lea.sflag [#allocation4], %s1291_s12  ;;  %s532_s20 = int_to_ptr.hbm [resolvable:$true] %s531_s20 }
 0x24f   : > { %s1062_s0 = sshra.s32 %s532_s20, 4  ;;  %s1068_s18 = scalar_lea.hbm %s1441_s5, 32  ;;  %s1063_s0 = int_to_ptr.hbm [resolvable:$true] %s1062_s0 }
 0x250   : > { %s1064_s16 = scalar_lea.hbm %s1063_s0, 16  ;;  %p1069_p0 = scmp.lt.s32.totalorder %s1063_s0, %s1441_s5 }
 0x251   : > { %p1065_p11 = scmp.ne.s32.totalorder %s1063_s0, %s1064_s16  ;;  %p1070_p4 = scmp.lt.s32.totalorder %s1068_s18, %s1064_s16 }
 0x253   : > { %p1066_p12 = pnand %p1065_p11, %p1271_p2  ;;  %p1071_p6 = por %p1070_p4, %p1069_p0 }
 0x254   : > { %v476_v48 = vpop.permute.xlu1 %475 }
 0x255   : > { %765 = vst.msk [vmem:[%s1317_s22 + $0x8] sm:$0xf] %vm447_vm5, %v476_v48  ;;  %p1067_p13 = pneg %p1066_p12 }
 0x257   : > { %p1072_p9 = pnand %p1071_p6, %p1067_p13 }
 0x25c   : > { %v491_v49 = vpop.permute.xlu1 %490 }
 0x25d   : > { %768 = vst.msk [vmem:[%s1317_s22 + $0xc] sm:$0xf] %vm447_vm5, %v491_v49 }
 0x25e   : > { %1075 = shalt.err (!%p1072_p9)
}
 0x25f   : > { %797 = dma.vmem_to_hbm [thread:$0]  (%p1271_p2), %s530_s8, 256, %s532_s20, %s506_s2, %s1459_s21, %s1459_s21, %s1156_s17  }
 0x260 PF: > { %s582_s12 = sand.u32 1, %s1118_s24   ;;  %p815_p10 = pnand %p743_p8, %p1243_p5 }
 0x261   : > { %s583_s22 = scalar_lea.sflag [#allocation4], %s582_s12 }
 0x262   : > { %p816_p1 = pneg %p815_p10 }
 0x264   : > { %1109 = dma.done.wait (%p816_p1), %s583_s22, 256  }
 0x265   : > { %1111 = vsyncadd (%p816_p1), %s583_s22, 4294967040  ;;  %s1460_s1 = sadd.s32 4294967294, %s1138_s29  }
 0x266   : > { %s592_s3 = sand.u32 1, %s1460_s1  }
 0x267   : > { %s593_s15 = scalar_lea.sflag [#allocation10], %s592_s3 }
 0x268   : > { %1113 = dma.done.wait (%p816_p1), %s593_s15, 512  }
 0x269   : > { %1115 = vsyncadd (%p816_p1), %s593_s15, 4294966784  ;;  %s28_s29 = sadd.s32 1, %s1138_s29   ;;  %s1461_s24 = smov %s1122_s25 }
 0x26a   : > { %p25_p2 = scmp.ge.s32.totalorder %s28_s29, 4   ;;  %s1462_s25 = smov %s1126_s26 }
 0x26b   : > { %s1463_s26 = smov %s1281_s19  ;;  %s1464_s27 = smov %s1134_s28 }
 0x26c   : > { %s1465_s28 = smov %s1467_s11  ;;  %27 = sbr.rel (!%p25_p2) target bundleno = 14 (0xe), region = 134 }
 0x271   :  { %609 = vsyncpa [#allocation3], 1 }
 0x272   :  { %611 = vsyncpa [#allocation3 + $0x1], 1 }
 0x273   :  { %612 = vsyncpa [#allocation6], 1 }
 0x274   :  { %613 = vsyncpa [#allocation4], 1 }
 0x275   :  { %615 = vsyncpa [#allocation4 + $0x1], 1 }
 0x276   :  { %616 = vsyncpa [#allocation10], 1 }
 0x277   :  { %618 = vsyncpa [#allocation10 + $0x1], 1 }

</bundles_post_ra>
